<compile_context>
chip_gen: v7x
topology: tpu7x:2x2x1
jax: 0.10.0
libtpu: 0.0.40
codegen_flags: <defaults>
</compile_context>

<pallas_src>
import functools

import jax
import jax.numpy as jnp
from jax import lax
from jax.experimental import pallas as pl
from jax.experimental.pallas import tpu as pltpu

_LANES = 128
_CHUNK = 8          # rows per vreg-resident chunk (f32 (8,128) == one vreg)
_GROUP = 4          # independent partial accumulators


def _focal_bce_kernel(x_ref, t_ref, acc_ref, *, n_valid, tile_rows,
                      alpha, gamma, bce_weight, focal_weight):
    c = pl.program_id(0)          # core-split index (parallel axis)
    i = pl.program_id(1)          # step within this core's row range
    steps = pl.num_programs(1)

    @pl.when(i == 0)
    def _():
        acc_ref[...] = jnp.zeros_like(acc_ref)

    # Fold reduction (1/N), loss weights and alpha into scalar constants:
    #   loss = ce * (BW + (A + B*t) * (1 - p_t)**gamma)
    inv_n = 1.0 / float(n_valid)
    bw = bce_weight * inv_n
    if alpha >= 0.0:
        a_const = focal_weight * (1.0 - alpha) * inv_n
        b_const = focal_weight * (2.0 * alpha - 1.0) * inv_n
    else:                          # torchvision: alpha < 0 disables alpha weighting
        a_const = focal_weight * inv_n
        b_const = 0.0
    g_exp = float(gamma)

    # Intended (unclamped) flat element offset of this tile; used for masking so
    # duplicated / partially-out-of-bounds blocks contribute exactly zero.
    tile_flat_off = (c * steps + i) * (tile_rows * _LANES)

    # Per-element flat offset within one (8,128) chunk — constant, hoisted.
    local_flat = (lax.broadcasted_iota(jnp.int32, (_CHUNK, _LANES), 0) * _LANES
                  + lax.broadcasted_iota(jnp.int32, (_CHUNK, _LANES), 1))

    def chunk_contrib(row0):
        x = x_ref[pl.ds(row0, _CHUNK), :].astype(jnp.float32)
        t = t_ref[pl.ds(row0, _CHUNK), :].astype(jnp.float32)

        e = jnp.exp(-jnp.abs(x))                 # exp(-|x|)          (EUP)
        log_term = jnp.log1p(e)                  # log(1+exp(-|x|))   (EUP)
        # BCEWithLogits, numerically stable: max(x,0) - x*t + log(1+exp(-|x|))
        ce = jnp.maximum(x, 0.0) - x * t + log_term

        inv = jnp.exp(-log_term)                 # 1/(1+e) on the EUP (no VPU divide)
        p = jnp.where(x >= 0.0, inv, e * inv)    # sigmoid(x)
        one_m = (p + t) - 2.0 * (p * t)          # 1 - p_t

        # (1 - p_t) ** gamma, specialized for small integer gamma (avoids pow).
        if g_exp == 0.0:
            mod = jnp.ones_like(one_m)
        elif g_exp.is_integer() and 0 < g_exp <= 8:
            mod = one_m
            for _ in range(int(g_exp) - 1):
                mod = mod * one_m
        else:
            mod = jnp.power(one_m, g_exp)

        if b_const != 0.0:
            scale = bw + (a_const + b_const * t) * mod
        else:
            scale = bw + a_const * mod
        loss = ce * scale

        # Mask ragged tail / stale rows of partial boundary blocks (garbage-safe:
        # jnp.where picks 0 even if the masked lanes produced inf/NaN).
        thresh = n_valid - (tile_flat_off + row0 * _LANES)
        return jnp.where(local_flat < thresh, loss, 0.0)

    n_chunks = tile_rows // _CHUNK
    n_groups = n_chunks // _GROUP
    rem = n_chunks % _GROUP

    zero = jnp.zeros((_CHUNK, _LANES), jnp.float32)
    parts = [zero, zero, zero, zero]

    if n_groups > 0:
        def body(g, accs):
            a0, a1, a2, a3 = accs
            base = pl.multiple_of(g * (_GROUP * _CHUNK), _GROUP * _CHUNK)
            return (a0 + chunk_contrib(base),
                    a1 + chunk_contrib(base + _CHUNK),
                    a2 + chunk_contrib(base + 2 * _CHUNK),
                    a3 + chunk_contrib(base + 3 * _CHUNK))
        parts = list(lax.fori_loop(0, n_groups, body, tuple(parts),
                                   unroll=2 if n_groups > 1 else 1))

    # Static epilogue for leftover chunks (tile_rows not a multiple of 32).
    for j in range(rem):
        parts[j] = parts[j] + chunk_contrib(n_groups * _GROUP * _CHUNK + j * _CHUNK)

    acc_ref[...] += (parts[0] + parts[1]) + (parts[2] + parts[3])


def focal_loss_bce(logits, targets, *, alpha=0.25, gamma=2.0,
                   bce_weight=1.0, focal_weight=1.0, max_tile_rows=4096):
    assert logits.shape == targets.shape
    n = int(logits.size)

    x_flat = logits.reshape(-1)
    t_flat = targets.reshape(-1)

    # Zero-copy lane-dense view when N is a multiple of 128 (common / demo case);
    # otherwise one minimal pad to the next lane multiple (values masked in-kernel).
    if n % _LANES:
        pad = _LANES - n % _LANES
        x_flat = jnp.pad(x_flat, (0, pad))
        t_flat = jnp.pad(t_flat, (0, pad))
    rows = x_flat.shape[0] // _LANES
    x2d = x_flat.reshape(rows, _LANES)
    t2d = t_flat.reshape(rows, _LANES)
    if rows < _CHUNK:                       # tiny inputs: pad up to one (8,128) tile
        x2d = jnp.pad(x2d, ((0, _CHUNK - rows), (0, 0)))
        t2d = jnp.pad(t2d, ((0, _CHUNK - rows), (0, 0)))
        rows = _CHUNK

    max_tile_rows = max(_CHUNK, (max_tile_rows // _CHUNK) * _CHUNK)
    tile_rows = min(max_tile_rows, (rows // _CHUNK) * _CHUNK)   # <= rows, mult of 8
    total_blocks = -(-rows // tile_rows)

    # v7x megacore: shard the row range across both TensorCores with a leading
    # "parallel" axis (private accumulator slab per core); sequential on v5e/v6e.
    num_splits = 2 if total_blocks >= 2 else 1
    steps = -(-total_blocks // num_splits)

    kernel = functools.partial(
        _focal_bce_kernel,
        n_valid=n, tile_rows=tile_rows,
        alpha=float(alpha), gamma=float(gamma),
        bce_weight=float(bce_weight), focal_weight=float(focal_weight),
    )

    def in_map(c, i):
        # Clamp so a fully out-of-range block (odd total_blocks with the 2-way
        # split) re-reads the last valid block; its contribution is masked to 0.
        return (jnp.minimum(c * steps + i, total_blocks - 1), 0)

    in_spec = pl.BlockSpec((tile_rows, _LANES), in_map)

    acc = pl.pallas_call(
        kernel,
        out_shape=jax.ShapeDtypeStruct((num_splits * _CHUNK, _LANES), jnp.float32),
        grid_spec=pltpu.PrefetchScalarGridSpec(
            num_scalar_prefetch=0,
            grid=(num_splits, steps),
            in_specs=[in_spec, in_spec],
            out_specs=pl.BlockSpec((_CHUNK, _LANES), lambda c, i: (c, 0)),
        ),
        compiler_params=pltpu.CompilerParams(
            dimension_semantics=("parallel", "arbitrary"),
            vmem_limit_bytes=32 * 1024 * 1024,
        ),
    )(x2d, t2d)

    # 1/N and both loss weights are already folded into the kernel; only this
    # tiny (num_splits*8, 128) reduce remains outside.
    return jnp.sum(acc)


def _reference(logits, targets, alpha=0.25, gamma=2.0,
               bce_weight=1.0, focal_weight=1.0):
    x = logits.astype(jnp.float32)
    t = targets.astype(jnp.float32)
    ce = jnp.maximum(x, 0.0) - x * t + jnp.log1p(jnp.exp(-jnp.abs(x)))
    p = jax.nn.sigmoid(x)
    p_t = p * t + (1 - p) * (1 - t)
    focal = ce * (1 - p_t) ** gamma
    alpha_t = alpha * t + (1 - alpha) * (1 - t)
    focal = alpha_t * focal
    return bce_weight * jnp.mean(ce) + focal_weight * jnp.mean(focal)


if __name__ == "__main__":
    key = jax.random.PRNGKey(0)
    k1, k2 = jax.random.split(key)
    # NCHW-shaped logits/targets, as a detection-style pixelwise loss would see.
    logits = jax.random.normal(k1, (2, 4, 16, 16), dtype=jnp.float32) * 2.0
    targets = (jax.random.uniform(k2, (2, 4, 16, 16)) > 0.7).astype(jnp.float32)

    out = focal_loss_bce(logits, targets, alpha=0.25, gamma=2.0,
                         bce_weight=1.0, focal_weight=1.0)
    out = jax.block_until_ready(out)

    ref = _reference(logits, targets)
    assert jnp.allclose(out, ref, rtol=1e-5, atol=1e-6), (out, ref)
    print("KERNEL_OK")
</pallas_src>

<mosaic_0001>
module attributes {stable_mosaic.version = 11 : i64} {
  func.func @_focal_bce_kernel(%arg0: i32, %arg1: i32, %arg2: memref<16x128xf32, #tpu.memory_space<vmem>>, %arg3: memref<16x128xf32, #tpu.memory_space<vmem>>, %arg4: memref<8x128xf32, #tpu.memory_space<vmem>>) attributes {dimension_semantics = [#tpu.dimension_semantics<parallel>, #tpu.dimension_semantics<arbitrary>], iteration_bounds = array<i64: 1, 1>, scalar_prefetch = 0 : i64, scratch_operands = 0 : i64, tpu.core_type = #tpu.core_type<tc>, window_params = [{transform_indices = @transform_0, window_bounds = array<i64: 16, 128>}, {transform_indices = @transform_1, window_bounds = array<i64: 16, 128>}, {transform_indices = @transform_2, window_bounds = array<i64: 8, 128>}]} {
    %c0_i32 = arith.constant 0 : i32
    %0 = arith.cmpi eq, %arg1, %c0_i32 : i32
    %1 = arith.extui %0 : i1 to i32
    %c0_i32_0 = arith.constant 0 : i32
    %2 = arith.cmpi ne, %1, %c0_i32_0 : i32
    scf.if %2 {
      %cst_32 = arith.constant 0.000000e+00 : f32
      %98 = vector.broadcast %cst_32 : f32 to vector<8x128xf32>
      %c0_33 = arith.constant 0 : index
      %c0_34 = arith.constant 0 : index
      %99 = vector.load %arg4[%c0_33, %c0_34] : memref<8x128xf32, #tpu.memory_space<vmem>>, vector<8x128xf32>
      tpu.vector_store %arg4[%c0_33, %c0_34], %98 {strides = array<i32>} : memref<8x128xf32, #tpu.memory_space<vmem>>, vector<8x128xf32>,
    } else {
    }
    %c1_i32 = arith.constant 1 : i32
    %3 = arith.muli %arg0, %c1_i32 : i32
    %4 = arith.addi %3, %arg1 : i32
    %c2048_i32 = arith.constant 2048 : i32
    %5 = arith.muli %4, %c2048_i32 : i32
    %6 = tpu.iota {dimensions = array<i32: 0>} : vector<8x128xi32>
    %c128_i32 = arith.constant 128 : i32
    %7 = vector.broadcast %c128_i32 : i32 to vector<8x128xi32>
    %8 = arith.muli %6, %7 : vector<8x128xi32>
    %9 = tpu.iota {dimensions = array<i32: 1>} : vector<8x128xi32>
    %10 = arith.addi %8, %9 : vector<8x128xi32>
    %cst = arith.constant 0.000000e+00 : f32
    %11 = vector.broadcast %cst : f32 to vector<8x128xf32>
    %c0 = arith.constant 0 : index
    %c0_1 = arith.constant 0 : index
    %12 = vector.load %arg2[%c0, %c0_1] : memref<16x128xf32, #tpu.memory_space<vmem>>, vector<8x128xf32>
    %c0_2 = arith.constant 0 : index
    %c0_3 = arith.constant 0 : index
    %13 = vector.load %arg3[%c0_2, %c0_3] : memref<16x128xf32, #tpu.memory_space<vmem>>, vector<8x128xf32>
    %14 = math.absf %12 : vector<8x128xf32>
    %cst_4 = arith.constant 0.000000e+00 : f32
    %15 = vector.broadcast %cst_4 : f32 to vector<8x128xf32>
    %16 = arith.subf %15, %14 : vector<8x128xf32>
    %17 = math.exp %16 : vector<8x128xf32>
    %18 = math.log1p %17 : vector<8x128xf32>
    %cst_5 = arith.constant 0.000000e+00 : f32
    %19 = vector.broadcast %cst_5 : f32 to vector<8x128xf32>
    %20 = arith.maximumf %12, %19 : vector<8x128xf32>
    %21 = arith.mulf %12, %13 : vector<8x128xf32>
    %22 = arith.subf %20, %21 : vector<8x128xf32>
    %23 = arith.addf %22, %18 : vector<8x128xf32>
    %cst_6 = arith.constant 0.000000e+00 : f32
    %24 = vector.broadcast %cst_6 : f32 to vector<8x128xf32>
    %25 = arith.subf %24, %18 : vector<8x128xf32>
    %26 = math.exp %25 : vector<8x128xf32>
    %cst_7 = arith.constant 0.000000e+00 : f32
    %27 = vector.broadcast %cst_7 : f32 to vector<8x128xf32>
    %28 = arith.cmpf oge, %12, %27 : vector<8x128xf32>
    %29 = arith.mulf %17, %26 : vector<8x128xf32>
    %30 = arith.select %28, %26, %29 : vector<8x128xi1>, vector<8x128xf32>
    %31 = arith.addf %30, %13 : vector<8x128xf32>
    %32 = arith.mulf %30, %13 : vector<8x128xf32>
    %cst_8 = arith.constant 2.000000e+00 : f32
    %33 = vector.broadcast %cst_8 : f32 to vector<8x128xf32>
    %34 = arith.mulf %33, %32 : vector<8x128xf32>
    %35 = arith.subf %31, %34 : vector<8x128xf32>
    %36 = arith.mulf %35, %35 : vector<8x128xf32>
    %cst_9 = arith.constant -2.44140625E-4 : f32
    %37 = vector.broadcast %cst_9 : f32 to vector<8x128xf32>
    %38 = arith.mulf %37, %13 : vector<8x128xf32>
    %cst_10 = arith.constant 3.66210938E-4 : f32
    %39 = vector.broadcast %cst_10 : f32 to vector<8x128xf32>
    %40 = arith.addf %39, %38 : vector<8x128xf32>
    %41 = arith.mulf %40, %36 : vector<8x128xf32>
    %cst_11 = arith.constant 4.8828125E-4 : f32
    %42 = vector.broadcast %cst_11 : f32 to vector<8x128xf32>
    %43 = arith.addf %42, %41 : vector<8x128xf32>
    %44 = arith.mulf %23, %43 : vector<8x128xf32>
    %c0_i32_12 = arith.constant 0 : i32
    %45 = arith.addi %5, %c0_i32_12 : i32
    %c2048_i32_13 = arith.constant 2048 : i32
    %46 = arith.subi %c2048_i32_13, %45 : i32
    %47 = vector.broadcast %46 : i32 to vector<8x128xi32>
    %48 = arith.cmpi slt, %10, %47 : vector<8x128xi32>
    %cst_14 = arith.constant 0.000000e+00 : f32
    %49 = vector.broadcast %cst_14 : f32 to vector<8x128xf32>
    %50 = arith.select %48, %44, %49 : vector<8x128xi1>, vector<8x128xf32>
    %51 = arith.addf %11, %50 : vector<8x128xf32>
    %c8 = arith.constant 8 : index
    %c0_15 = arith.constant 0 : index
    %52 = vector.load %arg2[%c8, %c0_15] : memref<16x128xf32, #tpu.memory_space<vmem>>, vector<8x128xf32>
    %c8_16 = arith.constant 8 : index
    %c0_17 = arith.constant 0 : index
    %53 = vector.load %arg3[%c8_16, %c0_17] : memref<16x128xf32, #tpu.memory_space<vmem>>, vector<8x128xf32>
    %54 = math.absf %52 : vector<8x128xf32>
    %cst_18 = arith.constant 0.000000e+00 : f32
    %55 = vector.broadcast %cst_18 : f32 to vector<8x128xf32>
    %56 = arith.subf %55, %54 : vector<8x128xf32>
    %57 = math.exp %56 : vector<8x128xf32>
    %58 = math.log1p %57 : vector<8x128xf32>
    %cst_19 = arith.constant 0.000000e+00 : f32
    %59 = vector.broadcast %cst_19 : f32 to vector<8x128xf32>
    %60 = arith.maximumf %52, %59 : vector<8x128xf32>
    %61 = arith.mulf %52, %53 : vector<8x128xf32>
    %62 = arith.subf %60, %61 : vector<8x128xf32>
    %63 = arith.addf %62, %58 : vector<8x128xf32>
    %cst_20 = arith.constant 0.000000e+00 : f32
    %64 = vector.broadcast %cst_20 : f32 to vector<8x128xf32>
    %65 = arith.subf %64, %58 : vector<8x128xf32>
    %66 = math.exp %65 : vector<8x128xf32>
    %cst_21 = arith.constant 0.000000e+00 : f32
    %67 = vector.broadcast %cst_21 : f32 to vector<8x128xf32>
    %68 = arith.cmpf oge, %52, %67 : vector<8x128xf32>
    %69 = arith.mulf %57, %66 : vector<8x128xf32>
    %70 = arith.select %68, %66, %69 : vector<8x128xi1>, vector<8x128xf32>
    %71 = arith.addf %70, %53 : vector<8x128xf32>
    %72 = arith.mulf %70, %53 : vector<8x128xf32>
    %cst_22 = arith.constant 2.000000e+00 : f32
    %73 = vector.broadcast %cst_22 : f32 to vector<8x128xf32>
    %74 = arith.mulf %73, %72 : vector<8x128xf32>
    %75 = arith.subf %71, %74 : vector<8x128xf32>
    %76 = arith.mulf %75, %75 : vector<8x128xf32>
    %cst_23 = arith.constant -2.44140625E-4 : f32
    %77 = vector.broadcast %cst_23 : f32 to vector<8x128xf32>
    %78 = arith.mulf %77, %53 : vector<8x128xf32>
    %cst_24 = arith.constant 3.66210938E-4 : f32
    %79 = vector.broadcast %cst_24 : f32 to vector<8x128xf32>
    %80 = arith.addf %79, %78 : vector<8x128xf32>
    %81 = arith.mulf %80, %76 : vector<8x128xf32>
    %cst_25 = arith.constant 4.8828125E-4 : f32
    %82 = vector.broadcast %cst_25 : f32 to vector<8x128xf32>
    %83 = arith.addf %82, %81 : vector<8x128xf32>
    %84 = arith.mulf %63, %83 : vector<8x128xf32>
    %c1024_i32 = arith.constant 1024 : i32
    %85 = arith.addi %5, %c1024_i32 : i32
    %c2048_i32_26 = arith.constant 2048 : i32
    %86 = arith.subi %c2048_i32_26, %85 : i32
    %87 = vector.broadcast %86 : i32 to vector<8x128xi32>
    %88 = arith.cmpi slt, %10, %87 : vector<8x128xi32>
    %cst_27 = arith.constant 0.000000e+00 : f32
    %89 = vector.broadcast %cst_27 : f32 to vector<8x128xf32>
    %90 = arith.select %88, %84, %89 : vector<8x128xi1>, vector<8x128xf32>
    %91 = arith.addf %11, %90 : vector<8x128xf32>
    %c0_28 = arith.constant 0 : index
    %c0_29 = arith.constant 0 : index
    %92 = vector.load %arg4[%c0_28, %c0_29] : memref<8x128xf32, #tpu.memory_space<vmem>>, vector<8x128xf32>
    %93 = arith.addf %51, %91 : vector<8x128xf32>
    %94 = arith.addf %11, %11 : vector<8x128xf32>
    %95 = arith.addf %93, %94 : vector<8x128xf32>
    %96 = arith.addf %92, %95 : vector<8x128xf32>
    %c0_30 = arith.constant 0 : index
    %c0_31 = arith.constant 0 : index
    %97 = vector.load %arg4[%c0_30, %c0_31] : memref<8x128xf32, #tpu.memory_space<vmem>>, vector<8x128xf32>
    tpu.vector_store %arg4[%c0_30, %c0_31], %96 {strides = array<i32>} : memref<8x128xf32, #tpu.memory_space<vmem>>, vector<8x128xf32>,
    return
  }
  func.func @transform_0(%arg0: i32, %arg1: i32) -> (i32, i32) {
    %c1_i32 = arith.constant 1 : i32
    %0 = arith.muli %arg0, %c1_i32 : i32
    %1 = arith.addi %0, %arg1 : i32
    %c0_i32 = arith.constant 0 : i32
    %2 = arith.minsi %1, %c0_i32 : i32
    %c0_i32_0 = arith.constant 0 : i32
    %c0_i32_1 = arith.constant 0 : i32
    return %2, %c0_i32_0 : i32, i32
  }
  func.func @transform_1(%arg0: i32, %arg1: i32) -> (i32, i32) {
    %c1_i32 = arith.constant 1 : i32
    %0 = arith.muli %arg0, %c1_i32 : i32
    %1 = arith.addi %0, %arg1 : i32
    %c0_i32 = arith.constant 0 : i32
    %2 = arith.minsi %1, %c0_i32 : i32
    %c0_i32_0 = arith.constant 0 : i32
    %c0_i32_1 = arith.constant 0 : i32
    return %2, %c0_i32_0 : i32, i32
  }
  func.func @transform_2(%arg0: i32, %arg1: i32) -> (i32, i32) {
    %c0_i32 = arith.constant 0 : i32
    %c0_i32_0 = arith.constant 0 : i32
    return %arg0, %c0_i32 : i32, i32
  }
}

</mosaic_0001>

<bundles_post_ra>
// kernel: tpu_custom_call.1
= control target key start
LH: loop header
LB: loop body
LE: loop exit
PB: predicated region body
PF: predicated region fallthrough
CT: control target
= control target key end

     0   :  { %7 = vsyncpa [#allocation3], 0  ;;  %s336_s0 = inlined_call_operand.hbm [shape: f32[16,128], index: 0, kind: input, shape index: {}]   ;;  %s337_s1 = inlined_call_operand.hbm [shape: f32[16,128], index: 1, kind: input, shape index: {}]   ;;  %s338_s2 = inlined_call_operand.hbm [shape: f32[8,128], index: 2, kind: output, shape index: {}]  }
   0x1   :  { %8 = vsyncpa [#allocation6], 0 }
   0x2   :  { %9 = vsyncpa [#allocation4], 0  ;;  %s268_s9 = smov [#allocation2]   ;;  %s196_s13 = scalar_lea.hbm %s336_s0, 256 }
   0x3   :  { %s21_s10 = sshll.u32 %s268_s9, 4  ;;  %p197_p0 = scmp.ne.s32.totalorder %s336_s0, %s196_s13  ;;  %s22_s10 = int_to_ptr.vmem [resolvable:$true] %s21_s10 }
   0x4   :  { %p200_p1 = scmp.lt.u32.totalorder %s196_s13, %s336_s0 }
   0x6   :  { %p202_p2 = pnand %p200_p1, %p197_p0 }
   0x8   :  { %205 = shalt.err (!%p202_p2)
}
   0x9   :  { %s206_s18 = scalar_lea.vmem %s22_s10, 256  ;;  %p211_p4 = scmp.lt.s32.totalorder %s22_s10, %s22_s10 }
   0xa   :  { %p207_p3 = scmp.ne.s32.totalorder %s22_s10, %s206_s18  ;;  %p212_p5 = scmp.lt.s32.totalorder %s206_s18, %s206_s18 }
   0xc   :  { %p213_p6 = por %p212_p5, %p211_p4 }
   0xe   :  { %p214_p7 = pnand %p213_p6, %p207_p3 }
  0x10   :  { %217 = shalt.err (!%p214_p7)
}
  0x11   :  { %s269_s19 = smov 128   ;;  %s270_s20 = smov 8  }
  0x12   :  { %27 = dma.hbm_to_vmem [thread:$0]  %s336_s0, 256, %s22_s10, [#allocation3], %s269_s19, %s269_s19, %s270_s20  }
  0x13   :  { %s271_s23 = smov [#allocation5]   ;;  %s218_s27 = scalar_lea.hbm %s337_s1, 256 }
  0x14   :  { %s39_s24 = sshll.u32 %s271_s23, 4  ;;  %p219_p8 = scmp.ne.s32.totalorder %s337_s1, %s218_s27  ;;  %s40_s24 = int_to_ptr.vmem [resolvable:$true] %s39_s24 }
  0x15   :  { %p222_p9 = scmp.lt.u32.totalorder %s218_s27, %s337_s1 }
  0x17   :  { %p224_p10 = pnand %p222_p9, %p219_p8 }
  0x19   :  { %227 = shalt.err (!%p224_p10)
}
  0x1a   :  { %s228_s4 = scalar_lea.vmem %s40_s24, 256  ;;  %p233_p12 = scmp.lt.s32.totalorder %s40_s24, %s40_s24 }
  0x1b   :  { %p229_p11 = scmp.ne.s32.totalorder %s40_s24, %s228_s4  ;;  %p234_p13 = scmp.lt.s32.totalorder %s228_s4, %s228_s4 }
  0x1d   :  { %p235_p0 = por %p234_p13, %p233_p12 }
  0x1f   :  { %p236_p1 = pnand %p235_p0, %p229_p11 }
  0x21   :  { %239 = shalt.err (!%p236_p1)
}
  0x22   :  { %45 = dma.hbm_to_vmem [thread:$0]  %s337_s1, 256, %s40_s24, [#allocation6], %s269_s19, %s269_s19, %s270_s20  }
  0x23   :  { %262 = dma.done.wait [#allocation3], 256  }
  0x24   :  { %263 = vsyncadd [#allocation3], 4294967040 }
  0x25   :  { %264 = dma.done.wait [#allocation6], 256  }
  0x26   :  { %265 = vsyncadd [#allocation6], 4294967040  ;;  %v312_v0 = vld [vmem:[#allocation2] sm:$0xff]  ;;  %v314_v1 = vld [vmem:[#allocation2 + $0x8] sm:$0xff]  ;;  %v67_v30 = vlaneseq  ;;  %s272_s1 = smov [#allocation7]  }
  0x27   :  { %v75_v2 = vand.u32 2147483647, %v312_v0  ;;  %v115_v3 = vand.u32 2147483647, %v314_v1  ;;  %vm95_vm2 = vcmp.ge.f32.partialorder %v312_v0, 0.0  ;;  %v74_v33 = vld [vmem:[#allocation5] sm:$0xff] }
  0x28   :  { %vm135_vm3 = vcmp.ge.f32.partialorder %v314_v1, 0.0  ;;  %v68_v35 = vshrl.u32 %v67_v30, 7  ;;  %v114_v36 = vld [vmem:[#allocation5 + $0x8] sm:$0xff]  ;;  %v88_v38 = vmax.f32 %v312_v0, 0.0  ;;  %v89_v39 = vmul.f32 %v74_v33, %v312_v0  ;;  %s164_s6 = sshll.u32 %s272_s1, 4  ;;  %s165_s6 = int_to_ptr.vmem [resolvable:$true] %s164_s6 }
  0x29   :  { %v76_v4 = vsub.f32 0.0, %v75_v2  ;;  %v116_v5 = vsub.f32 0.0, %v115_v3  ;;  %v103_v41 = vmul.f32 -0.00024414063, %v74_v33  ;;  %v128_v44 = vmax.f32 %v314_v1, 0.0  ;;  %s240_s7 = scalar_lea.vmem %s165_s6, 128  ;;  %p245_p3 = scmp.lt.s32.totalorder %s165_s6, %s165_s6 }
  0x2a   :  { %v129_v46 = vmul.f32 %v114_v36, %v314_v1  ;;  %v143_v49 = vmul.f32 -0.00024414063, %v114_v36  ;;  %v69_v51 = vmul.u32 128, %v68_v35  ;;  %v71_v52 = vand.u32 127, %v67_v30  ;;  %p241_p2 = scmp.ne.s32.totalorder %s165_s6, %s240_s7  ;;  %p246_p4 = scmp.lt.s32.totalorder %s240_s7, %s240_s7 }
  0x2b   :  { %v77_v6 = vmul.f32 1.442695, %v76_v4  ;;  %v117_v7 = vmul.f32 1.442695, %v116_v5  ;;  %v90_v54 = vsub.f32 %v88_v38, %v89_v39  ;;  %v104_v56 = vadd.f32 0.00036621094, %v103_v41 }
  0x2c   :  { %v130_v57 = vsub.f32 %v128_v44, %v129_v46  ;;  %v144_v59 = vadd.f32 0.00036621094, %v143_v49  ;;  %v72_v61 = vadd.s32 %v71_v52, %v69_v51  ;;  %p247_p5 = por %p246_p4, %p245_p3 }
  0x2d   :  { %184 = vpow2.f32 %v77_v6 }
  0x2e   :  { %186 = vpow2.f32 %v117_v7  ;;  %vm110_vm4 = vcmp.lt.s32.totalorder %v72_v61, 2048  ;;  %vm150_vm5 = vcmp.lt.s32.totalorder %v72_v61, 1024  ;;  %p248_p6 = pnand %p247_p5, %p241_p2 }
  0x37   :  { %v185_v8 = vpop.eup %184 }
  0x38   :  { %v187_v9 = vpop.eup %186  ;;  %v79_v10 = vadd.f32 1.0, %v185_v8  ;;  %v82_v12 = vmul.f32 -0.5, %v185_v8  ;;  %v85_v15 = vand.u32 2147483647, %v185_v8 }
  0x39   :  { %v119_v11 = vadd.f32 1.0, %v187_v9  ;;  %v122_v13 = vmul.f32 -0.5, %v187_v9  ;;  %v125_v17 = vand.u32 2147483647, %v187_v9 }
  0x3a   :  { %188 = vlog2.f32 %v79_v10  ;;  %v83_v14 = vadd.f32 1.0, %v82_v12  ;;  %vm86_vm0 = vcmp.lt.f32.partialorder %v85_v15, 0.0004427343 }
  0x3b   :  { %190 = vlog2.f32 %v119_v11  ;;  %v123_v16 = vadd.f32 1.0, %v122_v13  ;;  %vm126_vm1 = vcmp.lt.f32.partialorder %v125_v17, 0.0004427343 }
  0x3c   :  { %v84_v18 = vmul.f32 %v185_v8, %v83_v14 }
  0x3d   :  { %v124_v20 = vmul.f32 %v187_v9, %v123_v16 }
  0x44   :  { %v189_v19 = vpop.eup %188 }
  0x45   :  { %v191_v21 = vpop.eup %190  ;;  %v81_v22 = vmul.f32 0.6931472, %v189_v19 }
  0x46   :  { %v121_v23 = vmul.f32 0.6931472, %v191_v21 }
  0x47   :  { %v87_v24 = vsel %vm86_vm0, %v84_v18, %v81_v22 }
  0x48   :  { %v92_v25 = vsub.f32 0.0, %v87_v24  ;;  %v127_v26 = vsel %vm126_vm1, %v124_v20, %v121_v23  ;;  %v91_v63 = vadd.f32 %v90_v54, %v87_v24 }
  0x49   :  { %v132_v27 = vsub.f32 0.0, %v127_v26  ;;  %v131_v2 = vadd.f32 %v130_v57, %v127_v26 }
  0x4a   :  { %v93_v28 = vmul.f32 1.442695, %v92_v25 }
  0x4b   :  { %v133_v29 = vmul.f32 1.442695, %v132_v27 }
  0x4c   :  { %192 = vpow2.f32 %v93_v28 }
  0x4d   :  { %194 = vpow2.f32 %v133_v29 }
  0x56   :  { %v193_v31 = vpop.eup %192 }
  0x57   :  { %v195_v32 = vpop.eup %194  ;;  %v96_v34 = vmul.f32 %v193_v31, %v185_v8 }
  0x58   :  { %v136_v37 = vmul.f32 %v195_v32, %v187_v9 }
  0x59   :  { %v97_v40 = vsel %vm95_vm2, %v193_v31, %v96_v34 }
  0x5a   :  { %v98_v42 = vadd.f32 %v97_v40, %v74_v33  ;;  %v99_v43 = vmul.f32 %v97_v40, %v74_v33  ;;  %v137_v45 = vsel %vm135_vm3, %v195_v32, %v136_v37 }
  0x5b   :  { %v138_v47 = vadd.f32 %v137_v45, %v114_v36  ;;  %v139_v48 = vmul.f32 %v137_v45, %v114_v36 }
  0x5c   :  { %v100_v50 = vmul.f32 2.0, %v99_v43 }
  0x5d   :  { %v140_v53 = vmul.f32 2.0, %v139_v48 }
  0x5e   :  { %v101_v55 = vsub.f32 %v98_v42, %v100_v50 }
  0x5f   :  { %v141_v58 = vsub.f32 %v138_v47, %v140_v53 }
  0x60   :  { %v102_v60 = vmul.f32 %v101_v55, %v101_v55 }
  0x61   :  { %v142_v62 = vmul.f32 %v141_v58, %v141_v58 }
  0x62   :  { %v105_v0 = vmul.f32 %v104_v56, %v102_v60 }
  0x63   :  { %v145_v1 = vmul.f32 %v144_v59, %v142_v62 }
  0x64   :  { %v106_v3 = vadd.f32 0.00048828125, %v105_v0 }
  0x65   :  { %v146_v4 = vadd.f32 0.00048828125, %v145_v1 }
  0x66   :  { %v107_v5 = vmul.f32 %v106_v3, %v91_v63 }
  0x67   :  { %v147_v6 = vmul.f32 %v146_v4, %v131_v2 }
  0x68   :  { %v111_v7 = vsel %vm110_vm4, %v107_v5, 0.0 }
  0x69   :  { %v151_v8 = vsel %vm150_vm5, %v147_v6, 0.0 }
  0x6a   :  { %v154_v9 = vadd.f32 %v151_v8, %v111_v7 }
  0x6c   :  { %157 = vst [vmem:[#allocation7] sm:$0xff] %v154_v9 }
  0x6d   :  { %251 = shalt.err (!%p248_p6)
}
  0x6e   :  { %s252_s10 = scalar_lea.hbm %s338_s2, 128 }
  0x6f   :  { %p253_p7 = scmp.ne.s32.totalorder %s338_s2, %s252_s10  ;;  %p256_p8 = scmp.lt.u32.totalorder %s252_s10, %s338_s2 }
  0x71   :  { %p258_p9 = pnand %p256_p8, %p253_p7 }
  0x73   :  { %261 = shalt.err (!%p258_p9)
}
  0x74   :  { %167 = dma.vmem_to_hbm [thread:$0]  %s165_s6, 128, %s338_s2, [#allocation4]  }
  0x75   :  { %266 = dma.done.wait [#allocation4], 128  }
  0x76   :  { %267 = vsyncadd [#allocation4], 4294967168 }
  0x77   :  { %171 = vsyncpa [#allocation3], 1 }
  0x78   :  { %172 = vsyncpa [#allocation6], 1 }
  0x79   :  { %173 = vsyncpa [#allocation4], 1 }

</bundles_post_ra>
